<compile_context>
chip_gen: v5e
topology: v5e:2x2
jax: 0.10.0
libtpu: 0.0.40
codegen_flags: <defaults>
</compile_context>

<pallas_src>
import functools

import jax
import jax.numpy as jnp
from jax import lax
from jax.experimental import pallas as pl
from jax.experimental.pallas import tpu as pltpu


def _shift_aug_kernel(sx_ref, sy_ref, x_ref, o_ref, *, pad, nb):
    # sx_ref, sy_ref : SMEM (grid*nb,) int32 scalar-prefetched col / row shifts.
    # x_ref          : VMEM (nb, C, H, W) block of the *unpadded* input.
    # o_ref          : VMEM (nb, C, H, W) output block.
    blk = pl.program_id(0)
    _, c, h, w = x_ref.shape

    for i in range(nb):  # static unroll; nb <= 8
        b = blk * nb + i
        dx = sx_ref[b] - pad          # column shift in [-pad, pad]
        dy = sy_ref[b] - pad          # row shift in [-pad, pad]

        xf = x_ref[i].astype(jnp.float32)           # (C, H, W); f32 like the module

        # Row one-hot  R[c, i_out, j_src] = (j_src == clamp(i_out + dy, 0, H-1))
        io = lax.broadcasted_iota(jnp.int32, (c, h, h), 1)
        jo = lax.broadcasted_iota(jnp.int32, (c, h, h), 2)
        rsel = jnp.where(jo == jnp.clip(io + dy, 0, h - 1), 1.0, 0.0)

        # Col one-hot  Cm[c, w_src, k_out] = (w_src == clamp(k_out + dx, 0, W-1))
        wo = lax.broadcasted_iota(jnp.int32, (c, w, w), 1)
        ko = lax.broadcasted_iota(jnp.int32, (c, w, w), 2)
        csel = jnp.where(wo == jnp.clip(ko + dx, 0, w - 1), 1.0, 0.0)

        # Row shift then column shift: z[c,i,k] = xf[c, clamp(i+dy), clamp(k+dx)]
        y = jnp.einsum('chj,cjw->chw', rsel, xf,
                       preferred_element_type=jnp.float32)
        z = jnp.einsum('chw,cwk->chk', y, csel,
                       preferred_element_type=jnp.float32)

        o_ref[i] = z.astype(o_ref.dtype)


def _pick_nb(n, max_nb=8):
    """Batch elements per grid step.  No divisor requirement (cdiv grid +
    padded shift vectors handle any N); keep >= 2 grid steps when N >= 2 so
    both TensorCores get work on megacore parts (v7x)."""
    nb = min(n, max_nb)
    if n >= 2 and pl.cdiv(n, nb) < 2:
        nb = max(1, (n + 1) // 2)
    return nb


def shift_aug(x, shift, pad=3):
    """Pallas ShiftAug forward.

    x     : (N, C, H, W) array (float or integer dtype), H == W as in the module.
    shift : (N, 2) integer array in [0, 2*pad] -- shift[:, 0] is the column (x)
            shift, shift[:, 1] the row (y) shift (randomness drawn by the
            caller, mirroring torch.randint in the module's forward).
    Output has the input's dtype, matching `result.to(origin_dtype)`.
    """
    n, c, h, w = x.shape
    assert h == w, "ShiftAug (as written) assumes square images"
    assert jnp.issubdtype(shift.dtype, jnp.integer), (
        "shift must be integer-valued; non-integer shifts would require true "
        "bilinear interpolation which this kernel does not implement")

    # Guard against out-of-range shifts (cheap; keeps every gather in-bounds).
    shift = jnp.clip(shift.astype(jnp.int32), 0, 2 * pad)

    nb = _pick_nb(n)
    g = pl.cdiv(n, nb)
    total = g * nb
    sx = jnp.pad(shift[:, 0], (0, total - n))
    sy = jnp.pad(shift[:, 1], (0, total - n))

    out = pl.pallas_call(
        functools.partial(_shift_aug_kernel, pad=pad, nb=nb),
        out_shape=jax.ShapeDtypeStruct((n, c, h, w), x.dtype),
        grid_spec=pltpu.PrefetchScalarGridSpec(
            num_scalar_prefetch=2,
            grid=(g,),
            in_specs=[pl.BlockSpec((nb, c, h, w), lambda i, sx_r, sy_r: (i, 0, 0, 0))],
            out_specs=pl.BlockSpec((nb, c, h, w), lambda i, sx_r, sy_r: (i, 0, 0, 0)),
        ),
        compiler_params=pltpu.CompilerParams(
            dimension_semantics=("parallel",)),
    )(sx, sy, x)
    # TODO(synk): W < 128 means the output stores are lane-masked; padding the
    # lane dim to 128 inside the kernel would shave a little VPU/store work but
    # the kernel stays DMA-bound either way.
    return out


if __name__ == "__main__":
    key = jax.random.PRNGKey(0)
    kx, ks = jax.random.split(key)

    n, c, h, w = 2, 4, 16, 16
    pad = 3

    x = jax.random.normal(kx, (n, c, h, w), dtype=jnp.float32)
    # Random integer shift per batch element, same distribution as torch.randint(0, 2*pad+1).
    shift = jax.random.randint(ks, (n, 2), 0, 2 * pad + 1, dtype=jnp.int32)

    out = shift_aug(x, shift, pad=pad)
    jax.block_until_ready(out)

    # Pure-JAX reference of the exact same semantics (shifted gather of the
    # replicate-padded image).
    xpad = jnp.pad(x, ((0, 0), (0, 0), (pad, pad), (pad, pad)), mode="edge")
    ref = jnp.stack([
        lax.dynamic_slice(xpad[i], (0, int(shift[i, 1]), int(shift[i, 0])), (c, h, w))
        for i in range(n)
    ])
    assert out.shape == (n, c, h, w) and out.dtype == x.dtype
    # One-hot selection is exact for integer pixel values (the realistic use);
    # the loose tolerance only guards against MXU f32 pass-count differences
    # on random-normal test data while still catching any wrong-pixel bug (O(1) errors).
    assert jnp.allclose(out, ref, atol=1e-2, rtol=1e-2), "mismatch vs reference"

    print("KERNEL_OK")
</pallas_src>

<mosaic_0001>
module attributes {stable_mosaic.version = 11 : i64} {
  func.func @_shift_aug_kernel(%arg0: i32, %arg1: memref<2xi32, #tpu.memory_space<smem>>, %arg2: memref<2xi32, #tpu.memory_space<smem>>, %arg3: memref<1x4x16x16xf32, #tpu.memory_space<vmem>>, %arg4: memref<1x4x16x16xf32, #tpu.memory_space<vmem>>) attributes {dimension_semantics = [#tpu.dimension_semantics<parallel>], iteration_bounds = array<i64: 2>, scalar_prefetch = 2 : i64, scratch_operands = 0 : i64, tpu.core_type = #tpu.core_type<tc>, window_params = [{transform_indices = @transform_0, window_bounds = array<i64: 1, 4, 16, 16>}, {transform_indices = @transform_1, window_bounds = array<i64: 1, 4, 16, 16>}]} {
    %c1_i32 = arith.constant 1 : i32
    %0 = arith.muli %arg0, %c1_i32 : i32
    %c0_i32 = arith.constant 0 : i32
    %1 = arith.addi %0, %c0_i32 : i32
    %2 = arith.index_cast %1 : i32 to index
    %3 = memref.load %arg1[%2] : memref<2xi32, #tpu.memory_space<smem>>
    %c3_i32 = arith.constant 3 : i32
    %4 = arith.subi %3, %c3_i32 : i32
    %5 = arith.index_cast %1 : i32 to index
    %6 = memref.load %arg2[%5] : memref<2xi32, #tpu.memory_space<smem>>
    %c3_i32_0 = arith.constant 3 : i32
    %7 = arith.subi %6, %c3_i32_0 : i32
    %c0 = arith.constant 0 : index
    %c0_1 = arith.constant 0 : index
    %c0_2 = arith.constant 0 : index
    %c0_3 = arith.constant 0 : index
    %8 = vector.load %arg3[%c0, %c0_1, %c0_2, %c0_3] : memref<1x4x16x16xf32, #tpu.memory_space<vmem>>, vector<1x4x16x16xf32>
    %9 = vector.shape_cast %8 : vector<1x4x16x16xf32> to vector<4x16x16xf32>
    %10 = tpu.iota {dimensions = array<i32: 1>} : vector<4x16x16xi32>
    %11 = tpu.iota {dimensions = array<i32: 2>} : vector<4x16x16xi32>
    %12 = vector.broadcast %7 : i32 to vector<4x16x16xi32>
    %13 = arith.addi %10, %12 : vector<4x16x16xi32>
    %c0_i32_4 = arith.constant 0 : i32
    %c15_i32 = arith.constant 15 : i32
    %14 = vector.broadcast %c0_i32_4 : i32 to vector<4x16x16xi32>
    %15 = arith.maxsi %14, %13 : vector<4x16x16xi32>
    %16 = vector.broadcast %c15_i32 : i32 to vector<4x16x16xi32>
    %17 = arith.minsi %16, %15 : vector<4x16x16xi32>
    %18 = arith.cmpi eq, %11, %17 : vector<4x16x16xi32>
    %cst = arith.constant 1.000000e+00 : f32
    %cst_5 = arith.constant 0.000000e+00 : f32
    %19 = vector.broadcast %cst : f32 to vector<4x16x16xf32>
    %20 = vector.broadcast %cst_5 : f32 to vector<4x16x16xf32>
    %21 = arith.select %18, %19, %20 : vector<4x16x16xi1>, vector<4x16x16xf32>
    %22 = tpu.iota {dimensions = array<i32: 1>} : vector<4x16x16xi32>
    %23 = tpu.iota {dimensions = array<i32: 2>} : vector<4x16x16xi32>
    %24 = vector.broadcast %4 : i32 to vector<4x16x16xi32>
    %25 = arith.addi %23, %24 : vector<4x16x16xi32>
    %c0_i32_6 = arith.constant 0 : i32
    %c15_i32_7 = arith.constant 15 : i32
    %26 = vector.broadcast %c0_i32_6 : i32 to vector<4x16x16xi32>
    %27 = arith.maxsi %26, %25 : vector<4x16x16xi32>
    %28 = vector.broadcast %c15_i32_7 : i32 to vector<4x16x16xi32>
    %29 = arith.minsi %28, %27 : vector<4x16x16xi32>
    %30 = arith.cmpi eq, %22, %29 : vector<4x16x16xi32>
    %cst_8 = arith.constant 1.000000e+00 : f32
    %cst_9 = arith.constant 0.000000e+00 : f32
    %31 = vector.broadcast %cst_8 : f32 to vector<4x16x16xf32>
    %32 = vector.broadcast %cst_9 : f32 to vector<4x16x16xf32>
    %33 = arith.select %30, %31, %32 : vector<4x16x16xi1>, vector<4x16x16xf32>
    "tpu.trace_start"() <{level = 10 : i32, message = "chj,cjw->chw"}> : () -> ()
    %cst_10 = arith.constant dense<0.000000e+00> : vector<4x16x16xf32>
    %34 = tpu.matmul %21, %9, %cst_10 {dimension_numbers = #tpu.dot_dimension_numbers<[2], [1], [1], [2], [0, 0, 0, 1, 1, 2], [0], [0]>} : vector<4x16x16xf32>, vector<4x16x16xf32>, vector<4x16x16xf32> -> vector<4x16x16xf32>
    "tpu.trace_stop"() : () -> ()
    "tpu.trace_start"() <{level = 10 : i32, message = "chw,cwk->chk"}> : () -> ()
    %cst_11 = arith.constant dense<0.000000e+00> : vector<4x16x16xf32>
    %35 = tpu.matmul %34, %33, %cst_11 {dimension_numbers = #tpu.dot_dimension_numbers<[2], [1], [1], [2], [0, 0, 0, 1, 1, 2], [0], [0]>} : vector<4x16x16xf32>, vector<4x16x16xf32>, vector<4x16x16xf32> -> vector<4x16x16xf32>
    "tpu.trace_stop"() : () -> ()
    %c0_12 = arith.constant 0 : index
    %c0_13 = arith.constant 0 : index
    %c0_14 = arith.constant 0 : index
    %c0_15 = arith.constant 0 : index
    %36 = vector.load %arg4[%c0_12, %c0_13, %c0_14, %c0_15] : memref<1x4x16x16xf32, #tpu.memory_space<vmem>>, vector<1x4x16x16xf32>
    %37 = vector.shape_cast %36 : vector<1x4x16x16xf32> to vector<4x16x16xf32>
    %38 = vector.shape_cast %35 : vector<4x16x16xf32> to vector<1x4x16x16xf32>
    tpu.vector_store %arg4[%c0_12, %c0_13, %c0_14, %c0_15], %38 {strides = array<i32>} : memref<1x4x16x16xf32, #tpu.memory_space<vmem>>, vector<1x4x16x16xf32>,
    return
  }
  func.func @transform_0(%arg0: i32, %arg1: memref<2xi32, #tpu.memory_space<smem>>, %arg2: memref<2xi32, #tpu.memory_space<smem>>) -> (i32, i32, i32, i32) {
    %c0_i32 = arith.constant 0 : i32
    %c0_i32_0 = arith.constant 0 : i32
    %c0_i32_1 = arith.constant 0 : i32
    %c0_i32_2 = arith.constant 0 : i32
    return %arg0, %c0_i32, %c0_i32_0, %c0_i32_1 : i32, i32, i32, i32
  }
  func.func @transform_1(%arg0: i32, %arg1: memref<2xi32, #tpu.memory_space<smem>>, %arg2: memref<2xi32, #tpu.memory_space<smem>>) -> (i32, i32, i32, i32) {
    %c0_i32 = arith.constant 0 : i32
    %c0_i32_0 = arith.constant 0 : i32
    %c0_i32_1 = arith.constant 0 : i32
    %c0_i32_2 = arith.constant 0 : i32
    return %arg0, %c0_i32, %c0_i32_0, %c0_i32_1 : i32, i32, i32, i32
  }
}

</mosaic_0001>

<bundles_post_ra>
// kernel: tpu_custom_call.1
= control target key start
LH: loop header
LB: loop body
LE: loop exit
PB: predicated region body
PF: predicated region fallthrough
CT: control target
= control target key end

     0   :  { %s726_s18 = smov [#allocation3]   ;;  %s727_s19 = smov [#allocation4]   ;;  %s917_s0 = inlined_call_operand.hbm [shape: s32[2], index: 0, kind: input, shape index: {}]   ;;  %s918_s2 = inlined_call_operand.hbm [shape: f32[2,4,16,16], index: 2, kind: input, shape index: {}]   ;;  %s919_s3 = inlined_call_operand.hbm [shape: f32[2,4,16,16], index: 3, kind: output, shape index: {}]   ;;  %s920_s1 = inlined_call_operand.hbm [shape: s32[2], index: 1, kind: input, shape index: {}]  }
   0x1   :  { %s9_s14 = sshll.u32 %s917_s0, 4  ;;  %s14_s17 = sshll.u32 %s920_s1, 4  ;;  %s10_s14 = int_to_ptr.hbm [resolvable:$true] %s9_s14  ;;  %s15_s17 = int_to_ptr.hbm [resolvable:$true] %s14_s17 }
   0x2   :  { %12 = dma.hbm_to_smem %s10_s14, 16, %s726_s18, [#allocation2] }
   0x3   :  { %17 = dma.hbm_to_smem %s15_s17, 16, %s727_s19, [#allocation2] }
   0x4   :  { %700 = dma.done.wait [#allocation2], 32 }
   0x5   :  { %701 = vsyncadd [#allocation2], 4294967264 }
   0x6   :  { %20 = sfence }
   0x7   :  { %21 = vsyncpa [#allocation6], 0 }
   0x8   :  { %23 = vsyncpa [#allocation6 + $0x1], 0 }
   0x9   :  { %24 = vsyncpa [#allocation7], 0 }
   0xa   :  { %26 = vsyncpa [#allocation7 + $0x1], 0  ;;  %s760_s20 = smov 0   ;;  %s762_s0 = smov 0  }
   0xb   :  { %s764_s21 = smov 0   ;;  %s766_s1 = smov 0  }
   0xc LB: > { %s781_s22 = sadd.s32 4294967295, %s724_s1   ;;  %s506_s23 = sadd.s32 4294967294, %s724_s1   ;;  %s724_s1 = sphi %s766_s1, %s930_s1   ;;  %s720_s21 = sphi %s764_s21, %s929_s21   ;;  %s716_s0 = sphi %s762_s0, %s928_s0   ;;  %s712_s20 = sphi %s760_s20, %s927_s20  }
   0xd   : > { %s785_s24 = sadd.s32 1, %s724_s1   ;;  %s39_s25 = sadd.s32 1, %s720_s21 }
   0xe   : > { %s36_s26 = ssub.s32 %s724_s1, %s785_s24  ;;  %p46_p0 = scmp.ne.s32.totalorder %s720_s21, %s716_s0 }
   0xf   : > { %p37_p1 = scmp.eq.s32.totalorder %s36_s26, 0  ;;  %p47_p2 = scmp.eq.s32.totalorder %s724_s1, 0 }
  0x10   : > { %p52_p3 = scmp.ne.s32.totalorder %s716_s0, %s712_s20  ;;  %p53_p4 = scmp.eq.s32.totalorder %s781_s22, 0 }
  0x11   : > { %s797_s27 = scalar_select %p37_p1, %s720_s21, %s39_s25  }
  0x12   : > { %p799_p5 = por %p47_p2, %p46_p0  ;;  %p803_p6 = por %p53_p4, %p52_p3 }
  0x13   : > { %p76_p7 = scmp.eq.s32.totalorder %s781_s22, 1  ;;  %p82_p8 = scmp.eq.s32.totalorder %s506_s23, 1 }
  0x14   : > { %p560_p10 = scmp.lt.s32.totalorder %s724_s1, 2  ;;  %s102_s5 = sand.u32 1, %s720_s21  }
  0x15   : > { %p810_p11 = por %p76_p7, %p46_p0  ;;  %p814_p12 = por %p82_p8, %p52_p3 }
  0x16   : > { %s546_s6 = sshll.u32 %s724_s1, 6  ;;  %s509_s7 = sshll.u32 %s102_s5, 6 }
  0x17   : > { %s111_s10 = scalar_lea.hbm %s918_s2, %s546_s6  ;;  %s106_s12 = scalar_lea.vmem [#allocation5], %s509_s7 }
  0x18   : > { %s112_s11 = sshll.u32 %s111_s10, 4  ;;  %s114_s13 = sshll.u32 %s106_s12, 4  ;;  %s113_s11 = int_to_ptr.hbm [resolvable:$true] %s112_s11  ;;  %s115_s13 = int_to_ptr.vmem [resolvable:$true] %s114_s13 }
  0x19   : > { %p825_p13 = pnand %p560_p10, %p799_p5  ;;  %p512_p0 = scmp.ge.s32.totalorder %s724_s1, 1 }
  0x1a   : > { %p122_p1 = scmp.lt.s32.totalorder %s724_s1, 3  ;;  %s103_s15 = scalar_lea.sflag [#allocation6], %s102_s5 }
  0x1b   : > { %s626_s16 = sshra.s32 %s113_s11, 4  ;;  %p630_p3 = pneg %p825_p13  ;;  %s627_s16 = int_to_ptr.hbm [resolvable:$true] %s626_s16 }
  0x1c   : > { %s628_s17 = scalar_lea.hbm %s627_s16, 64  ;;  %s633_s23 = scalar_lea.hbm %s918_s2, 128 }
  0x1d   : > { %p629_p2 = scmp.ne.s32.totalorder %s627_s16, %s628_s17  ;;  %p634_p5 = scmp.lt.s32.totalorder %s627_s16, %s918_s2 }
  0x1e   : > { %p635_p8 = scmp.lt.s32.totalorder %s633_s23, %s628_s17 }
  0x1f   : > { %p631_p4 = pnand %p630_p3, %p629_p2 }
  0x20   : > { %p636_p10 = por %p635_p8, %p634_p5 }
  0x21   : > { %p632_p7 = pneg %p631_p4 }
  0x23   : > { %p637_p9 = pnand %p636_p10, %p632_p7 }
  0x25   : > { %640 = shalt.err (!%p637_p9)
}
  0x26   : > { %s728_s28 = smov 128   ;;  %s729_s5 = smov 8  }
  0x27   : > { %555 = dma.hbm_to_vmem [thread:$0]  (!%p825_p13), %s113_s11, 1024, %s115_s13, %s103_s15, %s728_s28, %s728_s28, %s729_s5  }
  0x28   : > { %p123_p2 = pnand %p512_p0, %p122_p1 }
  0x29   : > { %s846_s6 = sand.u32 (!%p123_p2), 1, %s716_s0  }
  0x2a   : > { %126 = sbr.rel (%p123_p2) target bundleno = 341 (0x155), region = 24  ;;  %s513_s7 = sshll.u32 (!%p123_p2), %s846_s6, 6 }
  0x2b   : > { %s129_s8 = scalar_lea.sflag (!%p123_p2), [#allocation6], %s846_s6  ;;  %s132_s9 = scalar_lea.vmem (!%p123_p2), [#allocation5], %s513_s7 }
  0x2f   : > { %703 = dma.done.wait (%p803_p6), %s129_s8, 1024  }
  0x30   : > { %705 = vsyncadd (%p803_p6), %s129_s8, 4294966272  ;;  %v164_v0 = vlaneseq  ;;  %s154_s10 = sld [smem:[#allocation4 + %s781_s22]]  ;;  %v161_v3 = vld [vmem:[%s132_s9 + $0x28] sm:$0xff]  ;;  %v163_v4 = vld [vmem:[%s132_s9 + $0x38] sm:$0xff]  ;;  %vm194_vm5 = vcmask 130048   ;;  %v730_v22 = vmov 0.0  }
  0x31   : > { %s152_s11 = sld [smem:[#allocation3 + %s781_s22]]  ;;  %v160_v5 = vld [vmem:[%s132_s9 + $0x20] sm:$0xff]  ;;  %261 = vmatpush.msra.mxu2 %v161_v3  ;;  %284 = vmatpush.msra.mxu3 %v163_v4  ;;  %v162_v6 = vld [vmem:[%s132_s9 + $0x30] sm:$0xff]  ;;  %v157_v9 = vld [vmem:[%s132_s9 + $0x8] sm:$0xff]  ;;  %v731_v25 = vmov 1.0   ;;  %s151_s13 = scalar_lea.vmem [#allocation8], %s513_s7 }
  0x32   : > { %v165_v1 = vshrl.u32 %v164_v0, 7  ;;  %v168_v7 = vand.u32 127, %v164_v0  ;;  %v159_v10 = vld [vmem:[%s132_s9 + $0x18] sm:$0xff]  ;;  %215 = vmatpush.msra.mxu0 %v157_v9  ;;  %v156_v13 = vld [vmem:[%s132_s9] sm:$0xff]  ;;  %v158_v14 = vld [vmem:[%s132_s9 + $0x10] sm:$0xff]  ;;  %s547_s14 = sshll.u32 %s781_s22, 6 }
  0x33   : > { %238 = vmatpush.msra.mxu1 %v159_v10  ;;  %262 = vmatpush.msra.mxu2 %v160_v5  ;;  %s429_s17 = scalar_lea.hbm %s919_s3, %s547_s14  ;;  %s430_s18 = sshll.u32 %s151_s13, 4  ;;  %s431_s18 = int_to_ptr.vmem [resolvable:$true] %s430_s18 }
  0x34   : > { %v166_v2 = vadd.s32 8, %v165_v1  ;;  %285 = vmatpush.msra.mxu3 %v162_v6  ;;  %216 = vmatpush.msra.mxu0 %v156_v13  ;;  %s432_s19 = sshll.u32 %s429_s17, 4  ;;  %s418_s22 = scalar_lea.sflag [#allocation7], %s846_s6  ;;  %s433_s19 = int_to_ptr.hbm [resolvable:$true] %s432_s19 }
  0x35   : > { %239 = vmatpush.msra.mxu1 %v158_v14  ;;  %s670_s23 = sshra.s32 %s433_s19, 4  ;;  %s676_s5 = scalar_lea.hbm %s919_s3, 128  ;;  %s671_s23 = int_to_ptr.hbm [resolvable:$true] %s670_s23 }
  0x36   : > { %s516_s12 = sadd.s32 4294967293, %s154_s10  ;;  %s672_s25 = scalar_lea.hbm %s671_s23, 64 }
  0x37   : > { %v169_v8 = vstv %s516_s12  ;;  %s515_s29 = sadd.s32 4294967293, %s152_s11  ;;  %p673_p6 = scmp.ne.s32.totalorder %s671_s23, %s672_s25 }
  0x38   : > { %v170_v11 = vadd.s32 %v169_v8, %v165_v1  ;;  %v171_v12 = vadd.s32 %v169_v8, %v166_v2  ;;  %v184_v15 = vstv %s515_s29  ;;  %p677_p0 = scmp.lt.s32.totalorder %s671_s23, %s919_s3  ;;  %p678_p1 = scmp.lt.s32.totalorder %s676_s5, %s672_s25 }
  0x39   : > { %v185_v16 = vadd.s32 %v184_v15, %v168_v7  ;;  %p674_p9 = pnand %p673_p6, %p810_p11 }
  0x3a   : > { %vm172_vm0 = vcmp.gt.s32.totalorder %v170_v11, 0  ;;  %vm174_vm1 = vcmp.gt.s32.totalorder %v171_v12, 0  ;;  %p679_p3 = por %p678_p1, %p677_p0 }
  0x3b   : > { %v173_v17 = vsel %vm172_vm0, %v170_v11, 0  ;;  %v175_v18 = vsel %vm174_vm1, %v171_v12, 0  ;;  %vm186_vm2 = vcmp.gt.s32.totalorder %v185_v16, 0  ;;  %p675_p13 = pneg %p674_p9 }
  0x3c   : > { %vm176_vm3 = vcmp.lt.s32.totalorder %v173_v17, 15  ;;  %vm178_vm4 = vcmp.lt.s32.totalorder %v175_v18, 15  ;;  %v187_v19 = vsel %vm186_vm2, %v185_v16, 0 }
  0x3d   : > { %v177_v20 = vsel %vm176_vm3, %v173_v17, 15  ;;  %vm188_vm6 = vcmp.lt.s32.totalorder %v187_v19, 15  ;;  %v179_v24 = vsel %vm178_vm4, %v175_v18, 15  ;;  %p680_p4 = pnand %p679_p3, %p675_p13 }
  0x3e   : > { %vm180_vm7 = vcmp.eq.s32.totalorder %v168_v7, %v177_v20  ;;  %v189_v21 = vsel %vm188_vm6, %v187_v19, 15  ;;  %vm181_vm10 = vcmp.eq.s32.totalorder %v168_v7, %v179_v24 }
  0x3f   : > { %v182_v23 = vsel %vm180_vm7, 1.0, %v730_v22  ;;  %vm191_vm8 = vcmp.eq.s32.totalorder %v166_v2, %v189_v21  ;;  %vm190_vm9 = vcmp.eq.s32.totalorder %v165_v1, %v189_v21  ;;  %v183_v26 = vsel %vm181_vm10, 1.0, %v730_v22 }
  0x40   : > { %521 = vmatmul.msk.f32.vlgmr.msra.gmra.mxu2 %vm194_vm5, %v182_v23  ;;  %523 = vmatmul.msk.f32.vlgmr.msra.gmra.mxu3 %vm194_vm5, %v182_v23 }
  0x41   : > { %517 = vmatmul.msk.f32.vlgmr.msra.gmra.mxu0 %vm194_vm5, %v182_v23  ;;  %519 = vmatmul.msk.f32.vlgmr.msra.gmra.mxu1 %vm194_vm5, %v182_v23 }
  0x42   : > { %533 = vmatpush.msk.msrb.mxu2 %vm191_vm8, %v731_v25  ;;  %537 = vmatpush.msk.msrb.mxu3 %vm191_vm8, %v731_v25 }
  0x43   : > { %525 = vmatpush.msk.msrb.mxu0 %vm191_vm8, %v731_v25  ;;  %529 = vmatpush.msk.msrb.mxu1 %vm191_vm8, %v731_v25 }
  0x44   : > { %534 = vmatpush.msk.msrb.mxu2 %vm190_vm9, %v731_v25  ;;  %538 = vmatpush.msk.msrb.mxu3 %vm190_vm9, %v731_v25 }
  0x45   : > { %526 = vmatpush.msk.msrb.mxu0 %vm190_vm9, %v731_v25  ;;  %530 = vmatpush.msk.msrb.mxu1 %vm190_vm9, %v731_v25 }
  0x48   : > { %522 = vmatmul.msk.f32.gmra.mxu2 %vm194_vm5, %v183_v26  ;;  %524 = vmatmul.msk.f32.gmra.mxu3 %vm194_vm5, %v183_v26 }
  0x49   : > { %518 = vmatmul.msk.f32.gmra.mxu0 %vm194_vm5, %v183_v26  ;;  %520 = vmatmul.msk.f32.gmra.mxu1 %vm194_vm5, %v183_v26 }
  0xbe   : > { %v218_v27 = vpop.f32.mrf.mxu0  ;;  %v241_v28 = vpop.f32.mrf.mxu1 }
  0xbf   : > { %527 = vmatmul.msk.f32.vlgmr.msrb.gmra.mxu0 %vm194_vm5, %v218_v27  ;;  %531 = vmatmul.msk.f32.vlgmr.msrb.gmra.mxu1 %vm194_vm5, %v241_v28 }
  0xc3   : > { %v264_v29 = vpop.f32.mrf.mxu2  ;;  %v287_v30 = vpop.f32.mrf.mxu3 }
  0xc4   : > { %535 = vmatmul.msk.f32.vlgmr.msrb.gmra.mxu2 %vm194_vm5, %v264_v29  ;;  %539 = vmatmul.msk.f32.vlgmr.msrb.gmra.mxu3 %vm194_vm5, %v287_v30 }
  0xc6   : > { %v221_v31 = vpop.f32.mrf.mxu0  ;;  %v244_v32 = vpop.f32.mrf.mxu1 }
  0xc7   : > { %528 = vmatmul.msk.f32.gmra.mxu0 %vm194_vm5, %v221_v31  ;;  %532 = vmatmul.msk.f32.gmra.mxu1 %vm194_vm5, %v244_v32 }
  0xcb   : > { %v267_v33 = vpop.f32.mrf.mxu2  ;;  %v290_v34 = vpop.f32.mrf.mxu3 }
  0xcc   : > { %536 = vmatmul.msk.f32.gmra.mxu2 %vm194_vm5, %v267_v33  ;;  %540 = vmatmul.msk.f32.gmra.mxu3 %vm194_vm5, %v290_v34 }
 0x13c   : > { %v316_v35 = vpop.f32.mrf.mxu0  ;;  %v345_v36 = vpop.f32.mrf.mxu1 }
 0x13d   : > { %409 = vst.msk [vmem:[%s151_s13] sm:$0xff] %vm194_vm5, %v316_v35 }
 0x13e   : > { %411 = vst.msk [vmem:[%s151_s13 + $0x10] sm:$0xff] %vm194_vm5, %v345_v36 }
 0x144   : > { %v319_v37 = vpop.f32.mrf.mxu0  ;;  %v348_v38 = vpop.f32.mrf.mxu1 }
 0x145   : > { %410 = vst.msk [vmem:[%s151_s13 + $0x8] sm:$0xff] %vm194_vm5, %v319_v37 }
 0x146   : > { %412 = vst.msk [vmem:[%s151_s13 + $0x18] sm:$0xff] %vm194_vm5, %v348_v38 }
 0x147   : > { %v374_v39 = vpop.f32.mrf.mxu2  ;;  %v403_v40 = vpop.f32.mrf.mxu3 }
 0x148   : > { %413 = vst.msk [vmem:[%s151_s13 + $0x20] sm:$0xff] %vm194_vm5, %v374_v39 }
 0x149   : > { %415 = vst.msk [vmem:[%s151_s13 + $0x30] sm:$0xff] %vm194_vm5, %v403_v40 }
 0x14f   : > { %v377_v41 = vpop.f32.mrf.mxu2  ;;  %v406_v42 = vpop.f32.mrf.mxu3 }
 0x150   : > { %414 = vst.msk [vmem:[%s151_s13 + $0x28] sm:$0xff] %vm194_vm5, %v377_v41 }
 0x151   : > { %416 = vst.msk [vmem:[%s151_s13 + $0x38] sm:$0xff] %vm194_vm5, %v406_v42 }
 0x152   : > { %683 = shalt.err (!%p680_p4)
}
 0x153   : > { %s732_s6 = smov 128   ;;  %s733_s9 = smov 8  }
 0x154   : > { %550 = dma.vmem_to_hbm [thread:$0]  (%p810_p11), %s431_s18, 1024, %s433_s19, %s418_s22, %s732_s6, %s732_s6, %s733_s9  }
 0x155 PF: > { %s447_s10 = sand.u32 1, %s712_s20   ;;  %p926_p7 = scmp.ge.s32.totalorder %s724_s1, 2 }
 0x156   : > { %s448_s11 = scalar_lea.sflag [#allocation7], %s447_s10 }
 0x157   : > { %p557_p5 = pnand %p926_p7, %p814_p12 }
 0x159   : > { %p558_p8 = pneg %p557_p5 }
 0x15b   : > { %707 = dma.done.wait (%p558_p8), %s448_s11, 1024  }
 0x15c   : > { %709 = vsyncadd (%p558_p8), %s448_s11, 4294966272  ;;  %p29_p10 = scmp.ge.s32.totalorder %s785_s24, 4   ;;  %s927_s20 = smov %s716_s0 }
 0x15d   : > { %s928_s0 = smov %s720_s21  ;;  %s929_s21 = smov %s797_s27 }
 0x15e   : > { %s930_s1 = smov %s785_s24  ;;  %31 = sbr.rel (!%p29_p10) target bundleno = 12 (0xc), region = 69 }
 0x163   :  { %454 = vsyncpa [#allocation6], 1 }
 0x164   :  { %456 = vsyncpa [#allocation6 + $0x1], 1 }
 0x165   :  { %457 = vsyncpa [#allocation7], 1 }
 0x166   :  { %459 = vsyncpa [#allocation7 + $0x1], 1 }

</bundles_post_ra>
